<compile_context>
chip_gen: v5e
topology: v5e:2x2
jax: 0.10.0
libtpu: 0.0.40
codegen_flags: <defaults>
</compile_context>

<pallas_src>
import math
import jax
import jax.numpy as jnp
from jax.experimental import pallas as pl
from jax.experimental.pallas import tpu as pltpu


def _round_up(x: int, m: int) -> int:
    return (x + m - 1) // m * m


def adaptive_avg_pool_matrix(l: int, l_prime: int) -> jnp.ndarray:
    """(l_prime, l) matrix M with M[i, j] = 1/count_i over PyTorch's adaptive window."""
    i = jnp.arange(l_prime)
    starts = (i * l) // l_prime                      # floor(i*L/out)
    ends = ((i + 1) * l + l_prime - 1) // l_prime    # ceil((i+1)*L/out)
    j = jnp.arange(l)
    mask = (j[None, :] >= starts[:, None]) & (j[None, :] < ends[:, None])
    counts = (ends - starts).astype(jnp.float32)
    return mask.astype(jnp.float32) / counts[:, None]


def avg_embedder_kernel(x_ref, w1_ref, b1_ref, w2_ref, b2_ref, p_ref,
                        out_ref, acc_ref):
    k = pl.program_id(0)

    @pl.when(k == 0)
    def _():
        acc_ref[...] = jnp.zeros_like(acc_ref)

    x = x_ref[...]                                    # (TL, 2)
    # Linear(2 -> d0_pad) on the VPU: two broadcast FMAs, no MXU pass.
    s = (x[:, 0:1] * w1_ref[0:1, :]
         + x[:, 1:2] * w1_ref[1:2, :]
         + b1_ref[...])                               # (TL, d0_pad)
    s = s * jax.nn.sigmoid(s)                         # SiLU (EUP)
    # Adaptive avg pool (partial, this sequence tile) BEFORE the second Linear.
    # Exact reorder: pool rows sum to 1, so P@(s@W2 + b2) == (P@s)@W2 + b2.
    acc_ref[...] += jnp.dot(p_ref[...], s, preferred_element_type=jnp.float32)

    @pl.when(k == pl.num_programs(0) - 1)
    def _():
        # Finalize: Linear(d0 -> d0) on the tiny pooled tensor, single store.
        out_ref[...] = (jnp.dot(acc_ref[...], w2_ref[...],
                                preferred_element_type=jnp.float32)
                        + b2_ref[...])


def avg_embedder_forward(x, w1, b1, w2, b2, l_prime: int, *, max_tl: int = 512):
    l, two = x.shape
    assert two == 2
    d0 = w1.shape[1]

    # Padded, lane-dense layout.
    d0_pad = _round_up(d0, 128)            # lane axis: multiple of 128
    lp_pad = _round_up(l_prime, 8)         # sublane axis: multiple of 8
    tl = min(max_tl, _round_up(l, 128))    # sequence tile (last dim of P block)
    l_pad = _round_up(l, tl)
    num_tiles = l_pad // tl

    f32 = jnp.float32
    x_p = jnp.pad(x.astype(f32), ((0, l_pad - l), (0, 0)))
    w1_p = jnp.pad(w1.astype(f32), ((0, 0), (0, d0_pad - d0)))
    b1_p = jnp.pad(b1.astype(f32).reshape(1, d0), ((0, 0), (0, d0_pad - d0)))
    w2_p = jnp.pad(w2.astype(f32), ((0, d0_pad - d0), (0, d0_pad - d0)))
    b2_p = jnp.pad(b2.astype(f32).reshape(1, d0), ((0, 0), (0, d0_pad - d0)))
    # Pool matrix: padded sequence columns and padded output rows are zero,
    # so padded positions contribute nothing (padding is exact).
    p = adaptive_avg_pool_matrix(l, l_prime)
    p_p = jnp.pad(p, ((0, lp_pad - l_prime), (0, l_pad - l)))

    out = pl.pallas_call(
        avg_embedder_kernel,
        out_shape=jax.ShapeDtypeStruct((lp_pad, d0_pad), jnp.float32),
        grid=(num_tiles,),
        in_specs=[
            pl.BlockSpec((tl, 2), lambda k: (k, 0)),            # x tile
            pl.BlockSpec((2, d0_pad), lambda k: (0, 0)),        # W1 (resident)
            pl.BlockSpec((1, d0_pad), lambda k: (0, 0)),        # b1 (resident)
            pl.BlockSpec((d0_pad, d0_pad), lambda k: (0, 0)),   # W2 (resident)
            pl.BlockSpec((1, d0_pad), lambda k: (0, 0)),        # b2 (resident)
            pl.BlockSpec((lp_pad, tl), lambda k: (0, k)),       # pool tile
        ],
        out_specs=pl.BlockSpec((lp_pad, d0_pad), lambda k: (0, 0)),
        scratch_shapes=[pltpu.VMEM((lp_pad, d0_pad), jnp.float32)],
        compiler_params=pltpu.CompilerParams(
            dimension_semantics=("arbitrary",)),   # sequence axis is a reduction
    )(x_p, w1_p, b1_p, w2_p, b2_p, p_p)

    # Slice away padding, then rearrange 'l d -> (l d)' (pure reshape glue).
    return out[:l_prime, :d0].reshape(l_prime * d0)


def init_params(key, d0: int):
    """Deterministic PyTorch-style uniform init for the two Linear layers."""
    k1, k2, k3, k4 = jax.random.split(key, 4)
    lim1 = 1.0 / math.sqrt(2)     # fan_in = 2
    lim2 = 1.0 / math.sqrt(d0)    # fan_in = d0
    w1 = jax.random.uniform(k1, (2, d0), jnp.float32, -lim1, lim1)
    b1 = jax.random.uniform(k2, (1, d0), jnp.float32, -lim1, lim1)
    w2 = jax.random.uniform(k3, (d0, d0), jnp.float32, -lim2, lim2)
    b2 = jax.random.uniform(k4, (1, d0), jnp.float32, -lim2, lim2)
    return w1, b1, w2, b2


def reference_forward(x, w1, b1, w2, b2, l_prime: int):
    """Pure-JAX reference of the PyTorch module (original op order)."""
    h = x @ w1 + b1
    h = h * jax.nn.sigmoid(h)
    h = h @ w2 + b2                              # (l, d0)
    p = adaptive_avg_pool_matrix(x.shape[0], l_prime)
    return (p @ h).reshape(-1)                   # (l_prime * d0,)


if __name__ == "__main__":
    d0 = 6
    l_prime = 20
    l = 50  # not divisible by l_prime -> exercises uneven adaptive-pool windows

    key = jax.random.PRNGKey(0)
    kx, kp = jax.random.split(key)
    x = jax.random.normal(kx, (l, 2), dtype=jnp.float32)
    w1, b1, w2, b2 = init_params(kp, d0)

    out = avg_embedder_forward(x, w1, b1, w2, b2, l_prime)
    out = jax.block_until_ready(out)

    ref = reference_forward(x, w1, b1, w2, b2, l_prime)
    assert out.shape == (l_prime * d0,), out.shape
    assert jnp.allclose(out, ref, atol=1e-5, rtol=1e-5), "mismatch vs reference"

    print("KERNEL_OK")
</pallas_src>

<mosaic_0001>
module attributes {stable_mosaic.version = 11 : i64} {
  func.func @avg_embedder_kernel(%arg0: i32, %arg1: memref<128x2xf32, #tpu.memory_space<vmem>>, %arg2: memref<2x128xf32, #tpu.memory_space<vmem>>, %arg3: memref<1x128xf32, #tpu.memory_space<vmem>>, %arg4: memref<128x128xf32, #tpu.memory_space<vmem>>, %arg5: memref<1x128xf32, #tpu.memory_space<vmem>>, %arg6: memref<24x128xf32, #tpu.memory_space<vmem>>, %arg7: memref<24x128xf32, #tpu.memory_space<vmem>>, %arg8: memref<24x128xf32, #tpu.memory_space<vmem>>) attributes {dimension_semantics = [#tpu.dimension_semantics<arbitrary>], iteration_bounds = array<i64: 1>, scalar_prefetch = 0 : i64, scratch_operands = 1 : i64, tpu.core_type = #tpu.core_type<tc>, window_params = [{transform_indices = @transform_0, window_bounds = array<i64: 128, 2>}, {pipeline_mode = #tpu.pipeline_mode<synchronous>, transform_indices = @transform_1, window_bounds = array<i64: 2, 128>}, {pipeline_mode = #tpu.pipeline_mode<synchronous>, transform_indices = @transform_2, window_bounds = array<i64: 1, 128>}, {pipeline_mode = #tpu.pipeline_mode<synchronous>, transform_indices = @transform_3, window_bounds = array<i64: 128, 128>}, {pipeline_mode = #tpu.pipeline_mode<synchronous>, transform_indices = @transform_4, window_bounds = array<i64: 1, 128>}, {transform_indices = @transform_5, window_bounds = array<i64: 24, 128>}, {pipeline_mode = #tpu.pipeline_mode<synchronous>, transform_indices = @transform_6, window_bounds = array<i64: 24, 128>}]} {
    %c0_i32 = arith.constant 0 : i32
    %0 = arith.cmpi eq, %arg0, %c0_i32 : i32
    %1 = arith.extui %0 : i1 to i32
    %c0_i32_0 = arith.constant 0 : i32
    %2 = arith.cmpi ne, %1, %c0_i32_0 : i32
    scf.if %2 {
      %cst_16 = arith.constant 0.000000e+00 : f32
      %32 = vector.broadcast %cst_16 : f32 to vector<24x128xf32>
      %c0_17 = arith.constant 0 : index
      %c0_18 = arith.constant 0 : index
      %33 = vector.load %arg8[%c0_17, %c0_18] : memref<24x128xf32, #tpu.memory_space<vmem>>, vector<24x128xf32>
      tpu.vector_store %arg8[%c0_17, %c0_18], %32 {strides = array<i32>} : memref<24x128xf32, #tpu.memory_space<vmem>>, vector<24x128xf32>,
    } else {
    }
    %c0 = arith.constant 0 : index
    %c0_1 = arith.constant 0 : index
    %3 = vector.load %arg1[%c0, %c0_1] : memref<128x2xf32, #tpu.memory_space<vmem>>, vector<128x2xf32>
    %4 = vector.extract_strided_slice %3 {offsets = [0, 0], sizes = [128, 1], strides = [1, 1]} : vector<128x2xf32> to vector<128x1xf32>
    %c0_2 = arith.constant 0 : index
    %c0_3 = arith.constant 0 : index
    %5 = vector.load %arg2[%c0_2, %c0_3] : memref<2x128xf32, #tpu.memory_space<vmem>>, vector<1x128xf32>
    %6 = vector.broadcast %4 : vector<128x1xf32> to vector<128x128xf32>
    %7 = vector.broadcast %5 : vector<1x128xf32> to vector<128x128xf32>
    %8 = arith.mulf %6, %7 : vector<128x128xf32>
    %9 = vector.extract_strided_slice %3 {offsets = [0, 1], sizes = [128, 1], strides = [1, 1]} : vector<128x2xf32> to vector<128x1xf32>
    %c1 = arith.constant 1 : index
    %c0_4 = arith.constant 0 : index
    %10 = vector.load %arg2[%c1, %c0_4] : memref<2x128xf32, #tpu.memory_space<vmem>>, vector<1x128xf32>
    %11 = vector.broadcast %9 : vector<128x1xf32> to vector<128x128xf32>
    %12 = vector.broadcast %10 : vector<1x128xf32> to vector<128x128xf32>
    %13 = arith.mulf %11, %12 : vector<128x128xf32>
    %14 = arith.addf %8, %13 : vector<128x128xf32>
    %c0_5 = arith.constant 0 : index
    %c0_6 = arith.constant 0 : index
    %15 = vector.load %arg3[%c0_5, %c0_6] : memref<1x128xf32, #tpu.memory_space<vmem>>, vector<1x128xf32>
    %16 = vector.broadcast %15 : vector<1x128xf32> to vector<128x128xf32>
    %17 = arith.addf %14, %16 : vector<128x128xf32>
    %18 = arith.negf %17 : vector<128x128xf32>
    %19 = math.exp %18 : vector<128x128xf32>
    %cst = arith.constant 1.000000e+00 : f32
    %20 = vector.broadcast %cst : f32 to vector<128x128xf32>
    %21 = arith.addf %20, %19 : vector<128x128xf32>
    %22 = arith.divf %20, %21 : vector<128x128xf32>
    %23 = arith.mulf %17, %22 : vector<128x128xf32>
    %c0_7 = arith.constant 0 : index
    %c0_8 = arith.constant 0 : index
    %24 = vector.load %arg8[%c0_7, %c0_8] : memref<24x128xf32, #tpu.memory_space<vmem>>, vector<24x128xf32>
    %c0_9 = arith.constant 0 : index
    %c0_10 = arith.constant 0 : index
    %25 = vector.load %arg6[%c0_9, %c0_10] : memref<24x128xf32, #tpu.memory_space<vmem>>, vector<24x128xf32>
    %cst_11 = arith.constant dense<0.000000e+00> : vector<24x128xf32>
    %26 = tpu.matmul %25, %23, %cst_11 {dimension_numbers = #tpu.dot_dimension_numbers<[1], [0], [0], [1], [0, 0, 1, 1], [], []>} : vector<24x128xf32>, vector<128x128xf32>, vector<24x128xf32> -> vector<24x128xf32>
    %27 = arith.addf %24, %26 : vector<24x128xf32>
    %c0_12 = arith.constant 0 : index
    %c0_13 = arith.constant 0 : index
    %28 = vector.load %arg8[%c0_12, %c0_13] : memref<24x128xf32, #tpu.memory_space<vmem>>, vector<24x128xf32>
    tpu.vector_store %arg8[%c0_12, %c0_13], %27 {strides = array<i32>} : memref<24x128xf32, #tpu.memory_space<vmem>>, vector<24x128xf32>,
    %c0_i32_14 = arith.constant 0 : i32
    %29 = arith.cmpi eq, %arg0, %c0_i32_14 : i32
    %30 = arith.extui %29 : i1 to i32
    %c0_i32_15 = arith.constant 0 : i32
    %31 = arith.cmpi ne, %30, %c0_i32_15 : i32
    scf.if %31 {
      %c0_16 = arith.constant 0 : index
      %c0_17 = arith.constant 0 : index
      %32 = vector.load %arg8[%c0_16, %c0_17] : memref<24x128xf32, #tpu.memory_space<vmem>>, vector<24x128xf32>
      %c0_18 = arith.constant 0 : index
      %c0_19 = arith.constant 0 : index
      %33 = vector.load %arg4[%c0_18, %c0_19] : memref<128x128xf32, #tpu.memory_space<vmem>>, vector<128x128xf32>
      %cst_20 = arith.constant dense<0.000000e+00> : vector<24x128xf32>
      %34 = tpu.matmul %32, %33, %cst_20 {dimension_numbers = #tpu.dot_dimension_numbers<[1], [0], [0], [1], [0, 0, 1, 1], [], []>} : vector<24x128xf32>, vector<128x128xf32>, vector<24x128xf32> -> vector<24x128xf32>
      %c0_21 = arith.constant 0 : index
      %c0_22 = arith.constant 0 : index
      %35 = vector.load %arg5[%c0_21, %c0_22] : memref<1x128xf32, #tpu.memory_space<vmem>>, vector<1x128xf32>
      %36 = vector.broadcast %35 : vector<1x128xf32> to vector<24x128xf32>
      %37 = arith.addf %34, %36 : vector<24x128xf32>
      %c0_23 = arith.constant 0 : index
      %c0_24 = arith.constant 0 : index
      %38 = vector.load %arg7[%c0_23, %c0_24] : memref<24x128xf32, #tpu.memory_space<vmem>>, vector<24x128xf32>
      tpu.vector_store %arg7[%c0_23, %c0_24], %37 {strides = array<i32>} : memref<24x128xf32, #tpu.memory_space<vmem>>, vector<24x128xf32>,
    } else {
    }
    return
  }
  func.func @transform_0(%arg0: i32) -> (i32, i32) {
    %c0_i32 = arith.constant 0 : i32
    %c0_i32_0 = arith.constant 0 : i32
    return %arg0, %c0_i32 : i32, i32
  }
  func.func @transform_1(%arg0: i32) -> (i32, i32) {
    %c0_i32 = arith.constant 0 : i32
    %c0_i32_0 = arith.constant 0 : i32
    %c0_i32_1 = arith.constant 0 : i32
    return %c0_i32, %c0_i32_0 : i32, i32
  }
  func.func @transform_2(%arg0: i32) -> (i32, i32) {
    %c0_i32 = arith.constant 0 : i32
    %c0_i32_0 = arith.constant 0 : i32
    %c0_i32_1 = arith.constant 0 : i32
    return %c0_i32, %c0_i32_0 : i32, i32
  }
  func.func @transform_3(%arg0: i32) -> (i32, i32) {
    %c0_i32 = arith.constant 0 : i32
    %c0_i32_0 = arith.constant 0 : i32
    %c0_i32_1 = arith.constant 0 : i32
    return %c0_i32, %c0_i32_0 : i32, i32
  }
  func.func @transform_4(%arg0: i32) -> (i32, i32) {
    %c0_i32 = arith.constant 0 : i32
    %c0_i32_0 = arith.constant 0 : i32
    %c0_i32_1 = arith.constant 0 : i32
    return %c0_i32, %c0_i32_0 : i32, i32
  }
  func.func @transform_5(%arg0: i32) -> (i32, i32) {
    %c0_i32 = arith.constant 0 : i32
    %c0_i32_0 = arith.constant 0 : i32
    return %c0_i32, %arg0 : i32, i32
  }
  func.func @transform_6(%arg0: i32) -> (i32, i32) {
    %c0_i32 = arith.constant 0 : i32
    %c0_i32_0 = arith.constant 0 : i32
    %c0_i32_1 = arith.constant 0 : i32
    return %c0_i32, %c0_i32_0 : i32, i32
  }
}

</mosaic_0001>

<bundles_post_ra>
// kernel: tpu_custom_call.1
= control target key start
LH: loop header
LB: loop body
LE: loop exit
PB: predicated region body
PF: predicated region fallthrough
CT: control target
= control target key end

     0   :  { %11 = vsyncpa [#allocation4], 0  ;;  %s1381_s0 = inlined_call_operand.vmem [shape: f32[128,2], index: 0, kind: input, shape index: {}]   ;;  %s1382_s1 = inlined_call_operand.vmem [shape: f32[2,128], index: 1, kind: input, shape index: {}]   ;;  %s1383_s2 = inlined_call_operand.vmem [shape: f32[1,128], index: 2, kind: input, shape index: {}]   ;;  %s1384_s3 = inlined_call_operand.vmem [shape: f32[128,128], index: 3, kind: input, shape index: {}]   ;;  %s1385_s4 = inlined_call_operand.vmem [shape: f32[1,128], index: 4, kind: input, shape index: {}]   ;;  %s1386_s5 = inlined_call_operand.hbm [shape: f32[24,128], index: 5, kind: input, shape index: {}]   ;;  %s1387_s6 = inlined_call_operand.hbm [shape: f32[24,128], index: 6, kind: output, shape index: {}]  }
   0x1   :  { %12 = vsyncpa [#allocation5], 0  ;;  %s27_s23 = sshll.u32 %s1386_s5, 4  ;;  %s904_s24 = smov [#allocation3]   ;;  %s28_s23 = int_to_ptr.hbm [resolvable:$true] %s27_s23 }
   0x2   :  { %s29_s25 = sshll.u32 %s904_s24, 4  ;;  %s905_s26 = smov 128   ;;  %s30_s25 = int_to_ptr.vmem [resolvable:$true] %s29_s25 }
   0x3   :  { %s906_s27 = smov 8  }
   0x4   :  { %35 = dma.hbm_to_vmem [thread:$0]  %s28_s23, 384, %s30_s25, [#allocation4], %s905_s26, %s905_s26, %s906_s27  }
   0x5   :  { %900 = dma.done.wait [#allocation4], 384  }
   0x6   :  { %901 = vsyncadd [#allocation4], 4294966912  ;;  %v907_v0 = vmov 0   ;;  %v62_v1 = vld [vmem:[%s1381_s0 + $0x78] sm:$0xff]  ;;  %v61_v2 = vld [vmem:[%s1381_s0 + $0x70] sm:$0xff]  ;;  %v908_v5 = vmov 1  }
   0x7   :  { %768 = vset.pattern.permute.xlu2 %v907_v0  ;;  %766 = vset.pattern.permute.xlu1 %v907_v0  ;;  %v60_v3 = vld [vmem:[%s1381_s0 + $0x68] sm:$0xff]  ;;  %v58_v4 = vld [vmem:[%s1381_s0 + $0x58] sm:$0xff]  ;;  %v53_v6 = vld [vmem:[%s1381_s0 + $0x30] sm:$0xff]  ;;  %s909_s23 = smov [#allocation6]   ;;  %s698_s5 = sshll.u32 %s1387_s6, 4  ;;  %s699_s5 = int_to_ptr.hbm [resolvable:$true] %s698_s5 }
   0x8   :  { %765 = vset.pattern.permute.xlu0 %v907_v0  ;;  %136 = vperm.xlu1 %766, %v61_v2   ;;  %v59_v7 = vld [vmem:[%s1381_s0 + $0x60] sm:$0xff]  ;;  %v57_v8 = vld [vmem:[%s1381_s0 + $0x50] sm:$0xff]  ;;  %v56_v9 = vld [vmem:[%s1381_s0 + $0x48] sm:$0xff] }
   0x9   :  { %141 = vperm.xlu0 %765, %v62_v1   ;;  %131 = vperm.xlu2 %768, %v60_v3   ;;  %v51_v10 = vld [vmem:[%s1381_s0 + $0x20] sm:$0xff]  ;;  %v54_v12 = vld [vmem:[%s1381_s0 + $0x38] sm:$0xff]  ;;  %v52_v13 = vld [vmem:[%s1381_s0 + $0x28] sm:$0xff] }
   0xa   :  { %v55_v11 = vld [vmem:[%s1381_s0 + $0x40] sm:$0xff]  ;;  %v48_v14 = vld [vmem:[%s1381_s0 + $0x8] sm:$0xff]  ;;  %v50_v15 = vld [vmem:[%s1381_s0 + $0x18] sm:$0xff] }
   0xb   :  { %v49_v16 = vld [vmem:[%s1381_s0 + $0x10] sm:$0xff]  ;;  %v47_v18 = vld [vmem:[%s1381_s0] sm:$0xff] }
   0xc   :  { %v1012_v19 = vld [vmem:[%s1382_s1] ss:$0 sm:$0xff]  ;;  %v1017_v20 = vld [vmem:[%s1382_s1 + $0x1] ss:$0 sm:$0xff] }
   0xd   :  { %v1024_v25 = vld [vmem:[%s1383_s2] ss:$0 sm:$0xff] }
  0x10   :  { %767 = vset.pattern.permute.xlu1 %v908_v5 }
  0x11   :  { %121 = vperm.xlu0 %765, %v58_v4   ;;  %769 = vset.pattern.permute.xlu2 %v908_v5 }
  0x12   :  { %219 = vperm.xlu1 %767, %v61_v2   ;;  %215 = vperm.xlu2 %769, %v60_v3  }
  0x19   :  { %96 = vperm.xlu0 %765, %v53_v6  }
  0x1a   :  { %770 = vset.pattern.permute.xlu1 %v907_v0  ;;  %211 = vperm.xlu2 %769, %v59_v7  }
  0x1b   :  { %126 = vperm.xlu1 %770, %v59_v7  }
  0x21   :  { %775 = vset.pattern.permute.xlu0 %v908_v5 }
  0x22   :  { %223 = vperm.xlu0 %775, %v62_v1   ;;  %772 = vset.pattern.permute.xlu2 %v907_v0 }
  0x23   :  { %771 = vset.pattern.permute.xlu1 %v908_v5  ;;  %116 = vperm.xlu2 %772, %v57_v8  }
  0x24   :  { %207 = vperm.xlu1 %771, %v58_v4  }
  0x2a   :  { %199 = vperm.xlu0 %775, %v56_v9  }
  0x2b   :  { %111 = vperm.xlu2 %772, %v56_v9  }
  0x2c   :  { %203 = vperm.xlu1 %771, %v57_v8  }
  0x32   :  { %179 = vperm.xlu0 %775, %v51_v10  }
  0x33   :  { %774 = vset.pattern.permute.xlu2 %v908_v5 }
  0x34   :  { %773 = vset.pattern.permute.xlu1 %v907_v0  ;;  %195 = vperm.xlu2 %774, %v55_v11  }
  0x35   :  { %106 = vperm.xlu1 %773, %v55_v11  }
  0x3a   :  { %780 = vset.pattern.permute.xlu0 %v907_v0 }
  0x3b   :  { %71 = vperm.xlu0 %780, %v48_v14  }
  0x3c   :  { %191 = vperm.xlu2 %774, %v54_v12  }
  0x3d   :  { %101 = vperm.xlu1 %773, %v54_v12  }
  0x43   :  { %783 = vset.pattern.permute.xlu0 %v908_v5 }
  0x44   :  { %777 = vset.pattern.permute.xlu2 %v907_v0 }
  0x45   :  { %776 = vset.pattern.permute.xlu1 %v908_v5  ;;  %91 = vperm.xlu2 %777, %v52_v13  }
  0x46   :  { %187 = vperm.xlu1 %776, %v53_v6  }
  0x4d   :  { %86 = vperm.xlu2 %777, %v51_v10  }
  0x4e   :  { %183 = vperm.xlu1 %776, %v52_v13  }
  0x55   :  { %779 = vset.pattern.permute.xlu2 %v908_v5 }
  0x56   :  { %778 = vset.pattern.permute.xlu1 %v907_v0  ;;  %175 = vperm.xlu2 %779, %v50_v15  }
  0x57   :  { %81 = vperm.xlu1 %778, %v50_v15  }
  0x5e   :  { %171 = vperm.xlu2 %779, %v49_v16  }
  0x5f   :  { %76 = vperm.xlu1 %778, %v49_v16  }
  0x63   :  { %v132_v17 = vpop.permute.xlu2 %131 }
  0x64   :  { %v158_v22 = vmul.f32 %v1012_v19, %v132_v17 }
  0x66   :  { %782 = vset.pattern.permute.xlu2 %v907_v0 }
  0x67   :  { %781 = vset.pattern.permute.xlu1 %v908_v5  ;;  %66 = vperm.xlu2 %782, %v47_v18  }
  0x68   :  { %167 = vperm.xlu1 %781, %v48_v14  }
  0x6c   :  { %v216_v21 = vpop.permute.xlu2 %215 }
  0x6d   :  { %v240_v23 = vmul.f32 %v1017_v20, %v216_v21 }
  0x6f   :  { %v256_v24 = vadd.f32 %v240_v23, %v158_v22 }
  0x70   :  { %163 = vperm.xlu1 %781, %v47_v18  }
  0x71   :  { %v1027_v27 = vadd.f32 %v1024_v25, %v256_v24 }
  0x73   :  { %v724_v28 = vmul.f32 -1.442695, %v1027_v27 }
  0x74   :  { %v212_v26 = vpop.permute.xlu2 %211 }
  0x75   :  { %788 = vpow2.f32 %v724_v28  ;;  %v239_v43 = vmul.f32 %v1017_v20, %v212_v26 }
  0x7a   :  { %v137_v29 = vpop.permute.xlu1 %136 }
  0x7b   :  { %v142_v30 = vpop.permute.xlu0 %141  ;;  %v789_v33 = vpop.eup %788  ;;  %v159_v35 = vmul.f32 %v1012_v19, %v137_v29 }
  0x7c   :  { %v1032_v39 = vadd.f32 1.0, %v789_v33  ;;  %v160_v51 = vmul.f32 %v1012_v19, %v142_v30 }
  0x7d   :  { %v117_v31 = vpop.permute.xlu2 %116 }
  0x7e   :  { %790 = vrcp.f32 %v1032_v39  ;;  %v155_v8 = vmul.f32 %v1012_v19, %v117_v31  ;;  %vm543_vm0 = vweird.f32 %v1032_v39  ;;  %v549_v15 = vand.u32 2147483648, %v1032_v39 }
  0x7f   :  { %v547_v21 = vand.u32 2147483647, %v1032_v39 }
  0x80   :  { %v550_v28 = vor.u32 1.1754944e-38, %v549_v15 }
  0x81   :  { %vm548_vm3 = vcmp.eq.f32.partialorder %v547_v21, 8.507059e+37 }
  0x83   :  { %v122_v32 = vpop.permute.xlu0 %121 }
  0x84   :  { %v220_v34 = vpop.permute.xlu1 %219  ;;  %v1043_v48 = vpop.eup %790  ;;  %v156_v56 = vmul.f32 %v1012_v19, %v122_v32 }
  0x85   :  { %v241_v36 = vmul.f32 %v1017_v20, %v220_v34  ;;  %v112_v37 = vpop.permute.xlu2 %111  ;;  %v539_v54 = vmul.f32 %v1043_v48, %v1032_v39  ;;  %vm544_vm1 = vweird.f32 %v1043_v48 }
  0x86   :  { %v154_v1 = vmul.f32 %v1012_v19, %v112_v37  ;;  %vm1087_vm2 = vmor %vm543_vm0, %vm544_vm1 }
  0x87   :  { %v257_v38 = vadd.f32 %v241_v36, %v159_v35  ;;  %v540_v62 = vsub.f32 1.0, %v539_v54 }
  0x89   :  { %v1035_v40 = vadd.f32 %v1024_v25, %v257_v38  ;;  %v541_v6 = vmul.f32 %v1043_v48, %v540_v62 }
  0x8b   :  { %v1037_v41 = vpop.permute.xlu0 %96  ;;  %v725_v42 = vmul.f32 -1.442695, %v1035_v40  ;;  %v542_v18 = vadd.f32 %v1043_v48, %v541_v6 }
  0x8c   :  { %v1120_v54 = vmul.f32 %v1012_v19, %v1037_v41 }
  0x8d   :  { %v127_v44 = vpop.permute.xlu1 %126  ;;  %792 = vpow2.f32 %v725_v42  ;;  %v546_v32 = vsel %vm1087_vm2, %v1043_v48, %v542_v18 }
  0x8e   :  { %v157_v45 = vmul.f32 %v1012_v19, %v127_v44  ;;  %v196_v46 = vpop.permute.xlu2 %195 }
  0x8f   :  { %v235_v36 = vmul.f32 %v1017_v20, %v196_v46 }
  0x90   :  { %v255_v47 = vadd.f32 %v239_v43, %v157_v45  ;;  %v551_v43 = vsel %vm548_vm3, %v550_v28, %v546_v32 }
  0x92   :  { %v1046_v49 = vadd.f32 %v1024_v25, %v255_v47 }
  0x93   :  { %v793_v50 = vpop.eup %792 }
  0x94   :  { %v224_v52 = vpop.permute.xlu0 %223  ;;  %v1049_v53 = vadd.f32 1.0, %v793_v50  ;;  %v723_v55 = vmul.f32 -1.442695, %v1046_v49 }
  0x95   :  { %v242_v57 = vmul.f32 %v1017_v20, %v224_v52 }
  0x96   :  { %v208_v58 = vpop.permute.xlu1 %207  ;;  %794 = vrcp.f32 %v1049_v53  ;;  %v1058_v61 = vpop.permute.xlu2 %191  ;;  %v562_v42 = vand.u32 2147483647, %v1049_v53  ;;  %v564_v50 = vand.u32 2147483648, %v1049_v53  ;;  %vm558_vm4 = vweird.f32 %v1049_v53 }
  0x97   :  { %v258_v59 = vadd.f32 %v242_v57, %v160_v51  ;;  %v238_v60 = vmul.f32 %v1017_v20, %v208_v58  ;;  %796 = vpow2.f32 %v723_v55  ;;  %v234_v58 = vmul.f32 %v1017_v20, %v1058_v61 }
  0x98   :  { %vm1128_vm5 = vcmp.eq.f32.partialorder %v562_v42, 8.507059e+37  ;;  %v565_v62 = vor.u32 1.1754944e-38, %v564_v50 }
  0x99   :  { %v254_v63 = vadd.f32 %v238_v60, %v156_v56  ;;  %v1061_v0 = vadd.f32 %v1024_v25, %v258_v59  ;;  %v1123_v56 = vmul.f32 %v551_v43, %v1027_v27 }
  0x9b   :  { %v726_v2 = vmul.f32 -1.442695, %v1061_v0  ;;  %v1066_v3 = vadd.f32 %v1024_v25, %v254_v63 }
  0x9c   :  { %v1068_v4 = vpop.eup %794  ;;  %v200_v5 = vpop.permute.xlu0 %199 }
  0x9d   :  { %v797_v7 = vpop.eup %796  ;;  %v236_v9 = vmul.f32 %v1017_v20, %v200_v5  ;;  %798 = vpow2.f32 %v726_v2  ;;  %v722_v12 = vmul.f32 -1.442695, %v1066_v3  ;;  %v554_v17 = vmul.f32 %v1068_v4, %v1049_v53 }
  0x9e   :  { %v204_v10 = vpop.permute.xlu1 %203  ;;  %v1075_v11 = vadd.f32 1.0, %v797_v7  ;;  %vm559_vm6 = vweird.f32 %v1068_v4 }
  0x9f   :  { %v252_v13 = vadd.f32 %v236_v9, %v154_v1  ;;  %v237_v14 = vmul.f32 %v1017_v20, %v204_v10  ;;  %v1080_v16 = vpop.permute.xlu2 %91  ;;  %v555_v31 = vsub.f32 1.0, %v554_v17  ;;  %vm1152_vm10 = vmor %vm558_vm4, %vm559_vm6 }
  0xa0   :  { %800 = vrcp.f32 %v1075_v11  ;;  %vm528_vm7 = vweird.f32 %v1075_v11  ;;  %v532_v6 = vand.u32 2147483647, %v1075_v11  ;;  %v534_v7 = vand.u32 2147483648, %v1075_v11 }
  0xa1   :  { %v253_v22 = vadd.f32 %v237_v14, %v155_v8  ;;  %802 = vpow2.f32 %v722_v12  ;;  %v1092_v24 = vadd.f32 %v1024_v25, %v252_v13  ;;  %v556_v48 = vmul.f32 %v1068_v4, %v555_v31 }
  0xa2   :  { %vm1174_vm14 = vcmp.eq.f32.partialorder %v532_v6, 8.507059e+37  ;;  %v150_v6 = vmul.f32 %v1012_v19, %v1080_v16 }
  0xa3   :  { %v799_v26 = vpop.eup %798  ;;  %v1095_v29 = vadd.f32 %v1024_v25, %v253_v22  ;;  %v720_v34 = vmul.f32 -1.442695, %v1092_v24  ;;  %v557_v41 = vadd.f32 %v1068_v4, %v556_v48 }
  0xa4   :  { %v1097_v30 = vadd.f32 1.0, %v799_v26  ;;  %v180_v37 = vpop.permute.xlu0 %179 }
  0xa5   :  { %v721_v33 = vmul.f32 -1.442695, %v1095_v29  ;;  %v231_v46 = vmul.f32 %v1017_v20, %v180_v37  ;;  %v561_v17 = vsel %vm1152_vm10, %v1068_v4, %v557_v41 }
  0xa6   :  { %v1104_v35 = vpop.eup %800  ;;  %804 = vrcp.f32 %v1097_v30  ;;  %v579_v1 = vand.u32 2147483648, %v1097_v30  ;;  %vm573_vm8 = vweird.f32 %v1097_v30  ;;  %v577_v13 = vand.u32 2147483647, %v1097_v30 }
  0xa7   :  { %v803_v38 = vpop.eup %802  ;;  %v107_v39 = vpop.permute.xlu1 %106  ;;  %v524_v44 = vmul.f32 %v1104_v35, %v1075_v11  ;;  %806 = vpow2.f32 %v721_v33  ;;  %vm529_vm11 = vweird.f32 %v1104_v35 }
  0xa8   :  { %v153_v45 = vmul.f32 %v1012_v19, %v107_v39  ;;  %v87_v47 = vpop.permute.xlu2 %86  ;;  %v1116_v52 = vadd.f32 1.0, %v803_v38  ;;  %808 = vpow2.f32 %v720_v34  ;;  %v580_v22 = vor.u32 1.1754944e-38, %v579_v1  ;;  %vm1188_vm15 = vmor %vm528_vm7, %vm529_vm11 }
  0xa9   :  { %v149_v51 = vmul.f32 %v1012_v19, %v87_v47  ;;  %v525_v57 = vsub.f32 1.0, %v524_v44  ;;  %vm578_vm13 = vcmp.eq.f32.partialorder %v577_v13, 8.507059e+37  ;;  %v535_v34 = vor.u32 1.1754944e-38, %v534_v7 }
  0xaa   :  { %v251_v55 = vadd.f32 %v235_v36, %v153_v45  ;;  %810 = vrcp.f32 %v1116_v52  ;;  %v566_v36 = vsel %vm1128_vm5, %v565_v62, %v561_v17  ;;  %v519_v38 = vand.u32 2147483648, %v1116_v52 }
  0xab   :  { %v247_v63 = vadd.f32 %v231_v46, %v149_v51  ;;  %v526_v5 = vmul.f32 %v1104_v35, %v525_v57  ;;  %v597_v46 = vmul.f32 %v566_v36, %v1035_v40  ;;  %v517_v51 = vand.u32 2147483647, %v1116_v52 }
  0xac   :  { %v805_v60 = vpop.eup %804  ;;  %v1139_v2 = vadd.f32 %v1024_v25, %v251_v55  ;;  %vm513_vm1 = vweird.f32 %v1116_v52  ;;  %v520_v59 = vor.u32 1.1754944e-38, %v519_v38 }
  0xad   :  { %v807_v27 = vpop.eup %806  ;;  %v569_v61 = vmul.f32 %v805_v60, %v1097_v30  ;;  %vm574_vm9 = vweird.f32 %v805_v60  ;;  %v1164_v53 = vadd.f32 %v1024_v25, %v247_v63  ;;  %v527_v30 = vadd.f32 %v1104_v35, %v526_v5 }
  0xae   :  { %v1144_v8 = vadd.f32 1.0, %v807_v27  ;;  %v809_v9 = vpop.eup %808  ;;  %v719_v23 = vmul.f32 -1.442695, %v1139_v2  ;;  %vm1166_vm12 = vmor %vm573_vm8, %vm574_vm9  ;;  %vm518_vm3 = vcmp.eq.f32.partialorder %v517_v51, 8.507059e+37 }
  0xaf   :  { %v102_v10 = vpop.permute.xlu1 %101  ;;  %v570_v12 = vsub.f32 1.0, %v569_v61  ;;  %v1172_v31 = vadd.f32 1.0, %v809_v9  ;;  %v715_v44 = vmul.f32 -1.442695, %v1164_v53  ;;  %v531_v48 = vsel %vm1188_vm15, %v1104_v35, %v527_v30 }
  0xb0   :  { %v152_v15 = vmul.f32 %v1012_v19, %v102_v10  ;;  %812 = vrcp.f32 %v1144_v8  ;;  %v811_v18 = vpop.eup %810  ;;  %v502_v27 = vand.u32 2147483647, %v1144_v8  ;;  %v504_v63 = vand.u32 2147483648, %v1144_v8 }
  0xb1   :  { %v571_v21 = vmul.f32 %v805_v60, %v570_v12  ;;  %v509_v4 = vmul.f32 %v811_v18, %v1116_v52  ;;  %814 = vrcp.f32 %v1172_v31  ;;  %vm514_vm0 = vweird.f32 %v811_v18 }
  0xb2   :  { %v250_v26 = vadd.f32 %v234_v58, %v152_v15  ;;  %816 = vpow2.f32 %v719_v23  ;;  %vm1208_vm2 = vmor %vm513_vm1, %vm514_vm0  ;;  %vm498_vm5 = vweird.f32 %v1144_v8  ;;  %vm503_vm7 = vcmp.eq.f32.partialorder %v502_v27, 8.507059e+37 }
  0xb3   :  { %v572_v32 = vadd.f32 %v805_v60, %v571_v21  ;;  %v510_v37 = vsub.f32 1.0, %v509_v4  ;;  %818 = vpow2.f32 %v715_v44  ;;  %v505_v16 = vor.u32 1.1754944e-38, %v504_v63 }
  0xb4   :  { %v1193_v43 = vadd.f32 %v1024_v25, %v250_v26  ;;  %v487_v26 = vand.u32 2147483647, %v1172_v31  ;;  %vm483_vm9 = vweird.f32 %v1172_v31 }
  0xb5   :  { %v576_v39 = vsel %vm1166_vm12, %v805_v60, %v572_v32  ;;  %v511_v50 = vmul.f32 %v811_v18, %v510_v37 }
  0xb6   :  { %v813_v45 = vpop.eup %812  ;;  %v581_v47 = vsel %vm578_vm13, %v580_v22, %v576_v39  ;;  %v718_v60 = vmul.f32 -1.442695, %v1193_v43  ;;  %vm488_vm11 = vcmp.eq.f32.partialorder %v487_v26, 8.507059e+37  ;;  %v72_v26 = vpop.permute.xlu0 %71 }
  0xb7   :  { %v598_v11 = vmul.f32 %v581_v47, %v1061_v0  ;;  %v494_v55 = vmul.f32 %v813_v45, %v1144_v8  ;;  %v512_v58 = vadd.f32 %v811_v18, %v511_v50  ;;  %v536_v0 = vsel %vm1174_vm14, %v535_v34, %v531_v48  ;;  %v815_v62 = vpop.eup %814  ;;  %v176_v34 = vpop.permute.xlu2 %175 }
  0xb8   :  { %v188_v57 = vpop.permute.xlu1 %187  ;;  %820 = vpow2.f32 %v718_v60  ;;  %v817_v61 = vpop.eup %816  ;;  %vm499_vm4 = vweird.f32 %v813_v45  ;;  %v479_v9 = vmul.f32 %v815_v62, %v1172_v31  ;;  %v595_v12 = vmul.f32 %v536_v0, %v1046_v49 }
  0xb9   :  { %v233_v41 = vmul.f32 %v1017_v20, %v188_v57  ;;  %605 = vmatpush.msra.mxu0 %v598_v11  ;;  %727 = vmatpush.msra.mxu2 %v598_v11  ;;  %v495_v35 = vsub.f32 1.0, %v494_v55  ;;  %v516_v52 = vsel %vm1208_vm2, %v811_v18, %v512_v58  ;;  %v1220_v10 = vadd.f32 1.0, %v817_v61  ;;  %vm500_vm6 = vmor %vm498_vm5, %vm499_vm4  ;;  %v819_v15 = vpop.eup %818 }
  0xba   :  { %v521_v7 = vsel %vm518_vm3, %v520_v59, %v516_v52  ;;  %v480_v14 = vsub.f32 1.0, %v479_v9  ;;  %v489_v49 = vand.u32 2147483648, %v1172_v31  ;;  %vm484_vm8 = vweird.f32 %v815_v62 }
  0xbb   :  { %v249_v1 = vadd.f32 %v233_v41, %v1120_v54  ;;  %606 = vmatpush.msra.mxu0 %v597_v46  ;;  %728 = vmatpush.msra.mxu2 %v597_v46  ;;  %v496_v5 = vmul.f32 %v813_v45, %v495_v35  ;;  %822 = vrcp.f32 %v1220_v10  ;;  %v594_v17 = vmul.f32 %v521_v7, %v1066_v3  ;;  %vm485_vm10 = vmor %vm483_vm9, %vm484_vm8 }
  0xbc   :  { %v481_v23 = vmul.f32 %v815_v62, %v480_v14  ;;  %v490_v33 = vor.u32 1.1754944e-38, %v489_v49  ;;  %v1240_v36 = vadd.f32 1.0, %v819_v15  ;;  %v230_v47 = vmul.f32 %v1017_v20, %v176_v34 }
  0xbd   :  { %607 = vmatpush.msra.mxu0 %v1123_v56  ;;  %729 = vmatpush.msra.mxu2 %v1123_v56  ;;  %v497_v54 = vadd.f32 %v813_v45, %v496_v5  ;;  %v1227_v13 = vadd.f32 %v1024_v25, %v249_v1  ;;  %v474_v48 = vand.u32 2147483648, %v1220_v10  ;;  %vm468_vm13 = vweird.f32 %v1220_v10 }
  0xbe   :  { %v821_v8 = vpop.eup %820  ;;  %v482_v3 = vadd.f32 %v815_v62, %v481_v23  ;;  %v146_v34 = vmul.f32 %v1012_v19, %v72_v26 }
  0xbf   :  { %608 = vmatpush.msra.mxu0 %v595_v12  ;;  %730 = vmatpush.msra.mxu2 %v595_v12  ;;  %v501_v56 = vsel %vm500_vm6, %v813_v45, %v497_v54  ;;  %v717_v18 = vmul.f32 -1.442695, %v1227_v13  ;;  %v1236_v4 = vadd.f32 1.0, %v821_v8  ;;  %v475_v41 = vor.u32 1.1754944e-38, %v474_v48 }
  0xc0   :  { %v184_v21 = vpop.permute.xlu1 %183  ;;  %v506_v22 = vsel %vm503_vm7, %v505_v16, %v501_v56  ;;  %v486_v38 = vsel %vm485_vm10, %v815_v62, %v482_v3  ;;  %v172_v62 = vpop.permute.xlu2 %171  ;;  %vm408_vm7 = vweird.f32 %v1240_v36  ;;  %v414_v48 = vand.u32 2147483648, %v1240_v36 }
  0xc1   :  { %v232_v28 = vmul.f32 %v1017_v20, %v184_v21  ;;  %609 = vmatpush.msra.mxu0 %v594_v17  ;;  %731 = vmatpush.msra.mxu2 %v594_v17  ;;  %v593_v30 = vmul.f32 %v506_v22, %v1095_v29  ;;  %824 = vpow2.f32 %v717_v18  ;;  %v823_v37 = vpop.eup %822  ;;  %v491_v29 = vsel %vm488_vm11, %v490_v33, %v486_v38 }
  0xc2   :  { %826 = vrcp.f32 %v1236_v4  ;;  %v464_v39 = vmul.f32 %v823_v37, %v1220_v10  ;;  %v592_v42 = vmul.f32 %v491_v29, %v1092_v24  ;;  %vm469_vm12 = vweird.f32 %v823_v37 }
  0xc3   :  { %v248_v32 = vadd.f32 %v232_v28, %v150_v6  ;;  %610 = vmatpush.msra.mxu0 %v593_v30  ;;  %732 = vmatpush.msra.mxu2 %v593_v30  ;;  %828 = vrcp.f32 %v1240_v36  ;;  %v472_v24 = vand.u32 2147483647, %v1220_v10  ;;  %vm470_vm14 = vmor %vm468_vm13, %vm469_vm12  ;;  %v459_v52 = vand.u32 2147483648, %v1236_v4 }
  0xc4   :  { %v465_v44 = vsub.f32 1.0, %v464_v39  ;;  %v457_v61 = vand.u32 2147483647, %v1236_v4  ;;  %v229_v7 = vmul.f32 %v1017_v20, %v172_v62  ;;  %vm453_vm1 = vweird.f32 %v1236_v4 }
  0xc5   :  { %v1245_v31 = vadd.f32 %v1024_v25, %v248_v32  ;;  %611 = vmatpush.msra.mxu0 %v592_v42  ;;  %733 = vmatpush.msra.mxu2 %v592_v42  ;;  %vm473_vm15 = vcmp.eq.f32.partialorder %v472_v24, 8.507059e+37  ;;  %v460_v16 = vor.u32 1.1754944e-38, %v459_v52 }
  0xc6   :  { %v466_v51 = vmul.f32 %v823_v37, %v465_v44  ;;  %vm458_vm3 = vcmp.eq.f32.partialorder %v457_v61, 8.507059e+37 }
  0xc7   :  { %v825_v45 = vpop.eup %824  ;;  %v716_v50 = vmul.f32 -1.442695, %v1245_v31 }
  0xc8   :  { %v827_v11 = vpop.eup %826  ;;  %v1252_v55 = vadd.f32 1.0, %v825_v45  ;;  %v467_v59 = vadd.f32 %v823_v37, %v466_v51 }
  0xc9   :  { %v82_v46 = vpop.permute.xlu1 %81  ;;  %v449_v58 = vmul.f32 %v827_v11, %v1236_v4  ;;  %830 = vpow2.f32 %v716_v50  ;;  %v1258_v40 = vpop.eup %828  ;;  %vm454_vm0 = vweird.f32 %v827_v11 }
  0xca   :  { %v148_v57 = vmul.f32 %v1012_v19, %v82_v46  ;;  %832 = vrcp.f32 %v1252_v55  ;;  %v471_v35 = vsel %vm470_vm14, %v823_v37, %v467_v59  ;;  %v404_v10 = vmul.f32 %v1258_v40, %v1240_v36  ;;  %vm455_vm2 = vmor %vm453_vm1, %vm454_vm0 }
  0xcb   :  { %v450_v0 = vsub.f32 1.0, %v449_v58  ;;  %v476_v27 = vsel %vm473_vm15, %v475_v41, %v471_v35  ;;  %v444_v23 = vand.u32 2147483648, %v1252_v55  ;;  %v442_v30 = vand.u32 2147483647, %v1252_v55  ;;  %v67_v58 = vpop.permute.xlu2 %66 }
  0xcc   :  { %v246_v60 = vadd.f32 %v230_v47, %v148_v57  ;;  %v591_v1 = vmul.f32 %v476_v27, %v1139_v2  ;;  %v405_v22 = vsub.f32 1.0, %v404_v10  ;;  %vm438_vm5 = vweird.f32 %v1252_v55 }
  0xcd   :  { %v451_v63 = vmul.f32 %v827_v11, %v450_v0  ;;  %v445_v37 = vor.u32 1.1754944e-38, %v444_v23  ;;  %vm409_vm8 = vweird.f32 %v1258_v40  ;;  %vm443_vm9 = vcmp.eq.f32.partialorder %v442_v30, 8.507059e+37 }
  0xce   :  { %v1264_v5 = vadd.f32 %v1024_v25, %v246_v60  ;;  %612 = vmatpush.msra.mxu0 %v591_v1  ;;  %734 = vmatpush.msra.mxu2 %v591_v1  ;;  %v412_v47 = vand.u32 2147483647, %v1240_v36  ;;  %vm1299_vm10 = vmor %vm408_vm7, %vm409_vm8  ;;  %v415_v60 = vor.u32 1.1754944e-38, %v414_v48  ;;  %v145_v62 = vmul.f32 %v1012_v19, %v67_v58 }
  0xcf   :  { %v831_v6 = vpop.eup %830  ;;  %v452_v9 = vadd.f32 %v827_v11, %v451_v63 }
  0xd0   :  { %v833_v12 = vpop.eup %832  ;;  %v1270_v14 = vadd.f32 1.0, %v831_v6  ;;  %v714_v2 = vmul.f32 -1.442695, %v1264_v5  ;;  %vm413_vm13 = vcmp.eq.f32.partialorder %v412_v47, 8.507059e+37  ;;  %v655_v47 = vld [vmem:[%s1384_s3 + $0x60] sm:$0xff] }
  0xd1   :  { %v77_v54 = vpop.permute.xlu1 %76  ;;  %v456_v17 = vsel %vm455_vm2, %v827_v11, %v452_v9  ;;  %v434_v56 = vmul.f32 %v833_v12, %v1252_v55  ;;  %vm439_vm4 = vweird.f32 %v833_v12 }
  0xd2   :  { %v147_v15 = vmul.f32 %v1012_v19, %v77_v54  ;;  %v461_v49 = vsel %vm458_vm3, %v460_v16, %v456_v17  ;;  %834 = vrcp.f32 %v1270_v14  ;;  %vm440_vm6 = vmor %vm438_vm5, %vm439_vm4  ;;  %v429_v55 = vand.u32 2147483648, %v1270_v14 }
  0xd3   :  { %v590_v8 = vmul.f32 %v461_v49, %v1193_v43  ;;  %v435_v21 = vsub.f32 1.0, %v434_v56  ;;  %836 = vpow2.f32 %v714_v2  ;;  %v406_v43 = vmul.f32 %v1258_v40, %v405_v22 }
  0xd4   :  { %v245_v18 = vadd.f32 %v229_v7, %v147_v15  ;;  %vm423_vm12 = vweird.f32 %v1270_v14  ;;  %v430_v52 = vor.u32 1.1754944e-38, %v429_v55 }
  0xd5   :  { %613 = vmatpush.msra.mxu0 %v590_v8  ;;  %735 = vmatpush.msra.mxu2 %v590_v8  ;;  %v436_v28 = vmul.f32 %v833_v12, %v435_v21  ;;  %v407_v46 = vadd.f32 %v1258_v40, %v406_v43  ;;  %v658_v43 = vld [vmem:[%s1384_s3 + $0x78] sm:$0xff] }
  0xd6   :  { %v1280_v4 = vadd.f32 %v1024_v25, %v245_v18  ;;  %743 = vmatpush.msra.mxu3 %v658_v43  ;;  %663 = vmatpush.msra.mxu1 %v658_v43 }
  0xd7   :  { %v437_v3 = vadd.f32 %v833_v12, %v436_v28  ;;  %v411_v36 = vsel %vm1299_vm10, %v1258_v40, %v407_v46 }
  0xd8   :  { %v713_v32 = vmul.f32 -1.442695, %v1280_v4  ;;  %v835_v33 = vpop.eup %834  ;;  %v416_v9 = vsel %vm413_vm13, %v415_v60, %v411_v36  ;;  %v651_v36 = vld [vmem:[%s1384_s3 + $0x40] sm:$0xff] }
  0xd9   :  { %v441_v29 = vsel %vm440_vm6, %v833_v12, %v437_v3  ;;  %v419_v39 = vmul.f32 %v835_v33, %v1270_v14  ;;  %v837_v42 = vpop.eup %836  ;;  %vm424_vm11 = vweird.f32 %v835_v33  ;;  %v587_v19 = vmul.f32 %v416_v9, %v1164_v53  ;;  %v603_v9 = vld [vmem:[#allocation3 + $0x8] sm:$0xff] }
  0xda   :  { %v168_v38 = vpop.permute.xlu1 %167  ;;  %838 = vpow2.f32 %v713_v32  ;;  %v446_v45 = vsel %vm443_vm9, %v445_v37, %v441_v29  ;;  %v330_v51 = vadd.f32 1.0, %v837_v42  ;;  %vm425_vm14 = vmor %vm423_vm12, %vm424_vm11 }
  0xdb   :  { %v228_v44 = vmul.f32 %v1017_v20, %v168_v38  ;;  %v589_v50 = vmul.f32 %v446_v45, %v1227_v13  ;;  %v420_v11 = vsub.f32 1.0, %v419_v39  ;;  %v427_v13 = vand.u32 2147483647, %v1270_v14 }
  0xdc   :  { %840 = vrcp.f32 %v330_v51  ;;  %v397_v17 = vand.u32 2147483647, %v330_v51  ;;  %vm393_vm1 = vweird.f32 %v330_v51 }
  0xdd   :  { %v244_v24 = vadd.f32 %v228_v44, %v146_v34  ;;  %614 = vmatpush.msra.mxu0 %v589_v50  ;;  %736 = vmatpush.msra.mxu2 %v589_v50  ;;  %v421_v59 = vmul.f32 %v835_v33, %v420_v11  ;;  %vm428_vm15 = vcmp.eq.f32.partialorder %v427_v13, 8.507059e+37  ;;  %v657_v34 = vld [vmem:[%s1384_s3 + $0x70] sm:$0xff]  ;;  %v656_v44 = vld [vmem:[%s1384_s3 + $0x68] sm:$0xff]  ;;  %v654_v11 = vld [vmem:[%s1384_s3 + $0x58] sm:$0xff] }
  0xde   :  { %vm398_vm3 = vcmp.eq.f32.partialorder %v397_v17, 8.507059e+37  ;;  %744 = vmatpush.msra.mxu3 %v657_v34  ;;  %664 = vmatpush.msra.mxu1 %v657_v34 }
  0xdf   :  { %v1305_v41 = vadd.f32 %v1024_v25, %v244_v24  ;;  %v422_v35 = vadd.f32 %v835_v33, %v421_v59  ;;  %v653_v24 = vld [vmem:[%s1384_s3 + $0x50] sm:$0xff]  ;;  %v652_v59 = vld [vmem:[%s1384_s3 + $0x48] sm:$0xff] }
  0xe0   :  { %v839_v0 = vpop.eup %838  ;;  %745 = vmatpush.msra.mxu3 %v656_v44  ;;  %665 = vmatpush.msra.mxu1 %v656_v44 }
  0xe1   :  { %v329_v27 = vadd.f32 1.0, %v839_v0  ;;  %v712_v63 = vmul.f32 -1.442695, %v1305_v41  ;;  %v426_v1 = vsel %vm425_vm14, %v835_v33, %v422_v35 }
  0xe2   :  { %v164_v61 = vpop.permute.xlu1 %163  ;;  %v431_v7 = vsel %vm428_vm15, %v430_v52, %v426_v1  ;;  %v841_v10 = vpop.eup %840  ;;  %746 = vmatpush.msra.mxu3 %v655_v47  ;;  %666 = vmatpush.msra.mxu1 %v655_v47 }
  0xe3   :  { %v227_v6 = vmul.f32 %v1017_v20, %v164_v61  ;;  %842 = vrcp.f32 %v329_v27  ;;  %v588_v12 = vmul.f32 %v431_v7, %v1245_v31  ;;  %v389_v54 = vmul.f32 %v841_v10, %v330_v51  ;;  %v649_v61 = vld [vmem:[%s1384_s3 + $0x30] sm:$0xff] }
  0xe4   :  { %844 = vpow2.f32 %v712_v63  ;;  %v399_v20 = vand.u32 2147483648, %v330_v51  ;;  %vm394_vm0 = vweird.f32 %v841_v10  ;;  %v384_v22 = vand.u32 2147483648, %v329_v27  ;;  %747 = vmatpush.msra.mxu3 %v654_v11  ;;  %667 = vmatpush.msra.mxu1 %v654_v11 }
  0xe5   :  { %v243_v40 = vadd.f32 %v227_v6, %v145_v62  ;;  %615 = vmatpush.msra.mxu0 %v588_v12  ;;  %737 = vmatpush.msra.mxu2 %v588_v12  ;;  %v390_v16 = vsub.f32 1.0, %v389_v54  ;;  %vm395_vm2 = vmor %vm393_vm1, %vm394_vm0  ;;  %v382_v28 = vand.u32 2147483647, %v329_v27  ;;  %vm378_vm5 = vweird.f32 %v329_v27  ;;  %v648_v12 = vld [vmem:[%s1384_s3 + $0x28] sm:$0xff]  ;;  %v646_v54 = vld [vmem:[%s1384_s3 + $0x18] sm:$0xff] }
  0xe6   :  { %v400_v53 = vor.u32 1.1754944e-38, %v399_v20  ;;  %v385_v33 = vor.u32 1.1754944e-38, %v384_v22  ;;  %748 = vmatpush.msra.mxu3 %v653_v24  ;;  %668 = vmatpush.msra.mxu1 %v653_v24  ;;  %v643_v20 = vld [vmem:[%s1384_s3] sm:$0xff] }
  0xe7   :  { %v1317_v14 = vadd.f32 %v1024_v25, %v243_v40  ;;  %616 = vmatpush.msra.mxu0 %v587_v19  ;;  %738 = vmatpush.msra.mxu2 %v587_v19  ;;  %v391_v15 = vmul.f32 %v841_v10, %v390_v16  ;;  %vm383_vm7 = vcmp.eq.f32.partialorder %v382_v28, 8.507059e+37  ;;  %v647_v40 = vld [vmem:[%s1384_s3 + $0x20] sm:$0xff]  ;;  %v645_v19 = vld [vmem:[%s1384_s3 + $0x10] sm:$0xff] }
  0xe8   :  { %749 = vmatpush.msra.mxu3 %v652_v59  ;;  %669 = vmatpush.msra.mxu1 %v652_v59  ;;  %v604_v16 = vld [vmem:[#allocation3 + $0x10] sm:$0xff] }
  0xe9   :  { %v843_v2 = vpop.eup %842  ;;  %v711_v31 = vmul.f32 -1.442695, %v1317_v14  ;;  %v392_v18 = vadd.f32 %v841_v10, %v391_v15 }
  0xea   :  { %v845_v56 = vpop.eup %844  ;;  %v374_v49 = vmul.f32 %v843_v2, %v329_v27  ;;  %vm379_vm4 = vweird.f32 %v843_v2  ;;  %v650_v27 = vld [vmem:[%s1384_s3 + $0x38] sm:$0xff]  ;;  %750 = vmatpush.msra.mxu3 %v651_v36  ;;  %670 = vmatpush.msra.mxu1 %v651_v36 }
  0xeb   :  { %v328_v8 = vadd.f32 1.0, %v845_v56  ;;  %846 = vpow2.f32 %v711_v31  ;;  %v396_v25 = vsel %vm395_vm2, %v841_v10, %v392_v18  ;;  %vm380_vm6 = vmor %vm378_vm5, %vm379_vm4  ;;  %v602_v10 = vld [vmem:[#allocation3] sm:$0xff] }
  0xec   :  { %v375_v21 = vsub.f32 1.0, %v374_v49  ;;  %v401_v23 = vsel %vm398_vm3, %v400_v53, %v396_v25  ;;  %751 = vmatpush.msra.mxu3 %v650_v27  ;;  %671 = vmatpush.msra.mxu1 %v650_v27  ;;  %v787_v31 = vld [vmem:[%s1385_s4] ss:$0 sm:$0xff] }
  0xed   :  { %848 = vrcp.f32 %v328_v8  ;;  %v586_v30 = vmul.f32 %v401_v23, %v1264_v5  ;;  %v369_v48 = vand.u32 2147483648, %v328_v8  ;;  %vm363_vm9 = vweird.f32 %v328_v8 }
  0xee   :  { %v376_v26 = vmul.f32 %v843_v2, %v375_v21  ;;  %752 = vmatpush.msra.mxu3 %v649_v61  ;;  %672 = vmatpush.msra.mxu1 %v649_v61 }
  0xef   :  { %617 = vmatpush.msra.mxu0 %v586_v30  ;;  %739 = vmatpush.msra.mxu2 %v586_v30  ;;  %v370_v55 = vor.u32 1.1754944e-38, %v369_v48 }
  0xf0   :  { %v377_v3 = vadd.f32 %v843_v2, %v376_v26  ;;  %753 = vmatpush.msra.mxu3 %v648_v12  ;;  %673 = vmatpush.msra.mxu1 %v648_v12 }
  0xf1   :  { %v847_v32 = vpop.eup %846 }
  0xf2   :  { %v381_v37 = vsel %vm380_vm6, %v843_v2, %v377_v3  ;;  %v327_v38 = vadd.f32 1.0, %v847_v32  ;;  %754 = vmatpush.msra.mxu3 %v647_v40  ;;  %674 = vmatpush.msra.mxu1 %v647_v40 }
  0xf3   :  { %v849_v5 = vpop.eup %848  ;;  %v386_v29 = vsel %vm383_vm7, %v385_v33, %v381_v37 }
  0xf4   :  { %v585_v39 = vmul.f32 %v386_v29, %v1280_v4  ;;  %v359_v42 = vmul.f32 %v849_v5, %v328_v8  ;;  %850 = vrcp.f32 %v327_v38  ;;  %vm364_vm8 = vweird.f32 %v849_v5  ;;  %755 = vmatpush.msra.mxu3 %v646_v54  ;;  %675 = vmatpush.msra.mxu1 %v646_v54 }
  0xf5   :  { %v367_v4 = vand.u32 2147483647, %v328_v8  ;;  %vm365_vm10 = vmor %vm363_vm9, %vm364_vm8  ;;  %v354_v35 = vand.u32 2147483648, %v327_v38  ;;  %v352_v52 = vand.u32 2147483647, %v327_v38  ;;  %vm348_vm13 = vweird.f32 %v327_v38 }
  0xf6   :  { %618 = vmatpush.msra.mxu0 %v585_v39  ;;  %740 = vmatpush.msra.mxu2 %v585_v39  ;;  %v360_v45 = vsub.f32 1.0, %v359_v42 }
  0xf7   :  { %vm368_vm11 = vcmp.eq.f32.partialorder %v367_v4, 8.507059e+37  ;;  %vm353_vm15 = vcmp.eq.f32.partialorder %v352_v52, 8.507059e+37  ;;  %756 = vmatpush.msra.mxu3 %v645_v19  ;;  %676 = vmatpush.msra.mxu1 %v645_v19 }
  0xf8   :  { %v361_v50 = vmul.f32 %v849_v5, %v360_v45 }
  0xfa   :  { %v851_v46 = vpop.eup %850  ;;  %v362_v51 = vadd.f32 %v849_v5, %v361_v50 }
  0xfb   :  { %v344_v57 = vmul.f32 %v851_v46, %v327_v38  ;;  %vm349_vm12 = vweird.f32 %v851_v46 }
  0xfc   :  { %v366_v58 = vsel %vm365_vm10, %v849_v5, %v362_v51  ;;  %vm350_vm14 = vmor %vm348_vm13, %vm349_vm12 }
  0xfd   :  { %v371_v13 = vsel %vm368_vm11, %v370_v55, %v366_v58  ;;  %v345_v60 = vsub.f32 1.0, %v344_v57 }
  0xfe   :  { %v584_v0 = vmul.f32 %v371_v13, %v1305_v41  ;;  %v355_v41 = vor.u32 1.1754944e-38, %v354_v35 }
  0xff   :  { %v346_v62 = vmul.f32 %v851_v46, %v345_v60 }
 0x100   :  { %619 = vmatpush.msra.mxu0 %v584_v0  ;;  %741 = vmatpush.msra.mxu2 %v584_v0 }
 0x101   :  { %v347_v63 = vadd.f32 %v851_v46, %v346_v62 }
 0x103   :  { %v351_v1 = vsel %vm350_vm14, %v851_v46, %v347_v63 }
 0x104   :  { %v356_v6 = vsel %vm353_vm15, %v355_v41, %v351_v1 }
 0x105   :  { %v583_v7 = vmul.f32 %v356_v6, %v1317_v14  ;;  %v644_v14 = vld [vmem:[%s1384_s3 + $0x8] sm:$0xff]  ;;  %s696_s3 = sshll.u32 %s909_s23, 4  ;;  %s697_s3 = int_to_ptr.vmem [resolvable:$true] %s696_s3 }
 0x106   :  { %757 = vmatpush.msra.mxu3 %v644_v14  ;;  %677 = vmatpush.msra.mxu1 %v644_v14 }
 0x107   :  { %620 = vmatpush.msra.mxu0 %v583_v7  ;;  %742 = vmatpush.msra.mxu2 %v583_v7 }
 0x108   :  { %624 = vmatmul.f32.vlgmr.msra.gmra.mxu2 %v603_v9  ;;  %621 = vmatmul.f32.vlgmr.msra.gmra.mxu0 %v602_v10 }
 0x109   :  { %758 = vmatpush.msra.mxu3 %v643_v20  ;;  %678 = vmatpush.msra.mxu1 %v643_v20 }
 0x110   :  { %627 = vmatmul.f32.gmra.mxu2 %v604_v16 }
 0x185   :  { %v622_v2 = vpop.f32.mrf.mxu0 }
 0x186   :  { %679 = vmatmul.f32.vlgmr.msra.gmra.mxu1 %v622_v2 }
 0x18b   :  { %v625_v15 = vpop.f32.mrf.mxu2 }
 0x18c   :  { %682 = vmatmul.f32.vlgmr.msra.gmra.mxu3 %v625_v15 }
 0x193   :  { %v628_v17 = vpop.f32.mrf.mxu2 }
 0x194   :  { %685 = vmatmul.f32.gmra.mxu3 %v628_v17 }
 0x203   :  { %v680_v56 = vpop.f32.mrf.mxu1 }
 0x204   :  { %v681_v49 = vadd.f32 %v787_v31, %v680_v56 }
 0x206   :  { %689 = vst [vmem:[#allocation6] sm:$0xff] %v681_v49 }
 0x20f   :  { %v683_v18 = vpop.f32.mrf.mxu3 }
 0x210   :  { %v684_v8 = vadd.f32 %v787_v31, %v683_v18 }
 0x212   :  { %690 = vst [vmem:[#allocation6 + $0x8] sm:$0xff] %v684_v8 }
 0x217   :  { %v686_v53 = vpop.f32.mrf.mxu3 }
 0x218   :  { %v687_v21 = vadd.f32 %v787_v31, %v686_v53 }
 0x21a   :  { %691 = vst [vmem:[#allocation6 + $0x10] sm:$0xff] %v687_v21 }
 0x21b   :  { %704 = dma.vmem_to_hbm [thread:$0]  %s697_s3, 384, %s699_s5, [#allocation5], %s905_s26, %s905_s26, %s906_s27  }
 0x21c   :  { %902 = dma.done.wait [#allocation5], 384  }
 0x21d   :  { %903 = vsyncadd [#allocation5], 4294966912 }
 0x21e   :  { %709 = vsyncpa [#allocation4], 1 }
 0x21f   :  { %710 = vsyncpa [#allocation5], 1 }

</bundles_post_ra>
